<compile_context>
chip_gen: v5e
topology: v5e:2x2
jax: 0.10.0
libtpu: 0.0.40
codegen_flags: <defaults>
</compile_context>

<pallas_src>
import math
import functools

import jax
import jax.numpy as jnp
from jax.experimental import pallas as pl
from jax.experimental.pallas import tpu as pltpu


def _mha_kernel(q_in, k_in, v_in, w_qkv, b_qkv, o_ref, *, num_heads, d_k, tb, seq_len):
    """One grid step = `tb` batch rows.

    Block shapes:
      q_in/k_in/v_in : (tb, S, D)   D = num_heads * d_k
      w_qkv          : (3, D, D)    stacked, pre-transposed linear weights
                                    (Q weight/bias pre-scaled by 1/sqrt(d_k))
      b_qkv          : (3, 1, D)    stacked biases
      o_ref          : (tb, S, D)
    """
    S = seq_len
    H = num_heads
    D = H * d_k
    cdtype = q_in.dtype                      # native compute dtype (f32 or bf16)

    # Flatten the batch tile into the M dimension of the projection matmuls.
    xq = q_in[...].reshape(tb * S, D)
    xk = k_in[...].reshape(tb * S, D)
    xv = v_in[...].reshape(tb * S, D)

    # QKV projections: native-dtype MXU inputs, f32 accumulation; cast to the
    # compute dtype as part of the bias add so no extra f32 copies stay live.
    q = (jnp.dot(xq, w_qkv[0], preferred_element_type=jnp.float32) + b_qkv[0]).astype(cdtype)
    k = (jnp.dot(xk, w_qkv[1], preferred_element_type=jnp.float32) + b_qkv[1]).astype(cdtype)
    v = (jnp.dot(xv, w_qkv[2], preferred_element_type=jnp.float32) + b_qkv[2]).astype(cdtype)

    # Head split: fold (batch_row, head) into one batch dim so all tb*H heads run
    # as a single batched MXU contraction (no per-head sub-lane slices / loops).
    def split_heads(x):
        return jnp.swapaxes(x.reshape(tb, S, H, d_k), 1, 2).reshape(tb * H, S, d_k)

    qh = split_heads(q)
    kh = split_heads(k)
    vh = split_heads(v)

    # Scores: contract the shared last dim (scale already folded into Q weights).
    s = jnp.einsum("bqd,bkd->bqk", qh, kh,
                   preferred_element_type=jnp.float32)          # (tb*H, S, S)
    s = s - jnp.max(s, axis=-1, keepdims=True)

    if cdtype == jnp.float32:
        p = jnp.exp(s)
    else:
        # bf16 exp (EUP) halves vreg pressure of the (S,S) tiles on v6e/v7x;
        # harmless elsewhere (upcast internally on v5e).
        p = jnp.exp(s.astype(cdtype))
    denom = jnp.sum(p.astype(jnp.float32), axis=-1, keepdims=True)
    probs = p.astype(cdtype) * pl.reciprocal(denom, approx=True).astype(cdtype)

    o = jnp.einsum("bqk,bkd->bqd", probs, vh,
                   preferred_element_type=jnp.float32)          # (tb*H, S, d_k)
    o = o.reshape(tb, H, S, d_k)

    if d_k % 128 == 0:
        # Lane-aligned heads: store each head slab directly (still lane-dense,
        # avoids the final (H,S) <-> (S,H) relayout).
        for h in range(H):
            o_ref[:, :, h * d_k:(h + 1) * d_k] = o[:, h].astype(o_ref.dtype)
    else:
        # One lane-dense (tb, S, D) store per grid step.
        o_ref[...] = jnp.swapaxes(o, 1, 2).reshape(tb, S, D).astype(o_ref.dtype)


def _vmem_capacity_bytes():
    """Physical VMEM per core; conservative fallback if the query is unavailable."""
    try:
        return int(pltpu.get_tpu_info().vmem_capacity_bytes)
    except Exception:
        return 64 * 1024 * 1024      # v7x-sized conservative default


def _step_vmem_bytes(tb, S, D, H, in_itemsize, out_itemsize, w_itemsize):
    """Rough per-grid-step VMEM footprint estimate used to cap the batch tile."""
    act = tb * S * D
    io = 3 * 2 * act * in_itemsize + 2 * act * out_itemsize      # dbl-buffered q/k/v in + out
    w = (3 * D * D + 3 * D) * w_itemsize                         # single-buffered weights/bias
    interm = 3 * act * (4 + in_itemsize)                         # f32 projections + cdtype copies
    scores = 2 * tb * H * S * S * 4                              # score + prob tiles (f32)
    return io + w + interm + scores


def _auto_batch_tile(B, S, D, H, in_itemsize, out_itemsize, w_itemsize, budget):
    best = 1
    for tb in range(1, B + 1):
        if B % tb:
            continue
        if B >= 2 and B // tb < 2:
            # Keep >= 2 grid steps so the "parallel" batch axis can shard across
            # the two TensorCores of a v7x chip (no effect on v5e/v6e).
            continue
        if _step_vmem_bytes(tb, S, D, H, in_itemsize, out_itemsize, w_itemsize) > budget:
            continue
        best = tb
        if tb * S >= 256:            # enough M rows for the MXU; stop growing.
            break
    return best


def multi_headed_attention(query, key, value, params, *, num_heads, batch_tile=None):
    """params: dict with wq, bq, wk, bk, wv, bv (PyTorch Linear convention:
    weights are (d_out, d_in), biases are (d_out,))."""
    B, S, D = query.shape
    assert D % num_heads == 0, "d_model must be divisible by the number of heads"
    d_k = D // num_heads

    # Fold 1/sqrt(d_k) into the Q projection constants (free: weight-side
    # constant folding, removes a (tb*S, D) VPU multiply per grid step).
    scale = 1.0 / math.sqrt(d_k)
    w_qkv = jnp.stack([params["wq"].T * scale, params["wk"].T, params["wv"].T], axis=0)
    b_qkv = jnp.stack([params["bq"] * scale, params["bk"], params["bv"]],
                      axis=0).reshape(3, 1, D)

    vmem_cap = _vmem_capacity_bytes()
    # Scoped-VMEM limit: generous on v5e/v6e (128 MiB physical), tight on v7x (64 MiB).
    vmem_limit = min(int(vmem_cap * 0.75), 96 * 1024 * 1024)
    tile_budget = int(vmem_cap * 0.6)

    in_itemsize = jnp.dtype(query.dtype).itemsize
    w_itemsize = jnp.dtype(w_qkv.dtype).itemsize

    if batch_tile is None:
        batch_tile = _auto_batch_tile(B, S, D, num_heads, in_itemsize, in_itemsize,
                                      w_itemsize, tile_budget)
    tb = batch_tile
    assert B % tb == 0, "batch_tile must divide the batch size"

    kernel = functools.partial(_mha_kernel, num_heads=num_heads, d_k=d_k,
                               tb=tb, seq_len=S)

    qkv_spec = pl.BlockSpec((tb, S, D), lambda i: (i, 0, 0))
    # Constant-index weight/bias blocks never change: single pipeline buffer
    # (the default second buffer would be pure wasted VMEM).
    w_spec = pl.BlockSpec((3, D, D), lambda i: (0, 0, 0), pipeline_mode=pl.Buffered(1))
    b_spec = pl.BlockSpec((3, 1, D), lambda i: (0, 0, 0), pipeline_mode=pl.Buffered(1))

    return pl.pallas_call(
        kernel,
        out_shape=jax.ShapeDtypeStruct((B, S, D), query.dtype),
        grid_spec=pltpu.PrefetchScalarGridSpec(
            num_scalar_prefetch=0,
            grid=(B // tb,),
            in_specs=[qkv_spec, qkv_spec, qkv_spec, w_spec, b_spec],
            out_specs=pl.BlockSpec((tb, S, D), lambda i: (i, 0, 0)),
        ),
        compiler_params=pltpu.CompilerParams(
            dimension_semantics=("parallel",),
            vmem_limit_bytes=vmem_limit),
    )(query, key, value, w_qkv, b_qkv)


def _reference(query, key, value, params, *, num_heads):
    """Pure-JAX reference mirroring the PyTorch forward (no wo, no mask)."""
    B, S, D = query.shape
    d_k = D // num_heads
    q = query @ params["wq"].T + params["bq"]
    k = key @ params["wk"].T + params["bk"]
    v = value @ params["wv"].T + params["bv"]
    q = q.reshape(B, S, num_heads, d_k).transpose(0, 2, 1, 3)
    k = k.reshape(B, S, num_heads, d_k).transpose(0, 2, 1, 3)
    v = v.reshape(B, S, num_heads, d_k).transpose(0, 2, 1, 3)
    s = jnp.einsum("bhqd,bhkd->bhqk", q, k) / math.sqrt(d_k)
    p = jax.nn.softmax(s, axis=-1)
    o = jnp.einsum("bhqk,bhkd->bhqd", p, v)
    return o.transpose(0, 2, 1, 3).reshape(B, S, D)


def _linear_init(wkey, bkey, d_in, d_out):
    # Deterministic Kaiming-uniform-ish init like nn.Linear defaults.
    bound = 1.0 / math.sqrt(d_in)
    w = jax.random.uniform(wkey, (d_out, d_in), jnp.float32, -bound, bound)
    b = jax.random.uniform(bkey, (d_out,), jnp.float32, -bound, bound)
    return w, b


def _run_case(seed_key, B, S, d_model, h, batch_tile=None):
    keys = jax.random.split(seed_key, 12)
    wq, bq = _linear_init(keys[0], keys[1], d_model, d_model)
    wk, bk = _linear_init(keys[2], keys[3], d_model, d_model)
    wv, bv = _linear_init(keys[4], keys[5], d_model, d_model)
    # wo is created but never applied in the PyTorch forward — kept unused.
    _wo, _bo = _linear_init(keys[6], keys[7], d_model, d_model)

    params = {"wq": wq, "bq": bq, "wk": wk, "bk": bk, "wv": wv, "bv": bv}

    query = jax.random.normal(keys[8], (B, S, d_model), jnp.float32)
    key_t = jax.random.normal(keys[9], (B, S, d_model), jnp.float32)
    value = jax.random.normal(keys[10], (B, S, d_model), jnp.float32)

    out = multi_headed_attention(query, key_t, value, params, num_heads=h,
                                 batch_tile=batch_tile)
    out = jax.block_until_ready(out)

    ref = _reference(query, key_t, value, params, num_heads=h)
    assert out.shape == (B, S, d_model)
    # approx reciprocal in the softmax denominator -> slightly looser tolerance.
    assert jnp.allclose(out, ref, atol=5e-3, rtol=5e-3), "mismatch vs reference"


if __name__ == "__main__":
    root = jax.random.PRNGKey(0)
    k0, k1 = jax.random.split(root)

    # Small config matching the module defaults (auto batch tile -> tb=1, grid=(2,)).
    _run_case(k0, B=2, S=8, d_model=32, h=4)
    # Second config exercising a multi-step grid with an explicit batch tile.
    _run_case(k1, B=4, S=16, d_model=64, h=8, batch_tile=2)

    print("KERNEL_OK")
</pallas_src>

<mosaic_0001>
module attributes {stable_mosaic.version = 11 : i64} {
  func.func @_mha_kernel(%arg0: i32, %arg1: memref<1x8x32xf32, #tpu.memory_space<vmem>>, %arg2: memref<1x8x32xf32, #tpu.memory_space<vmem>>, %arg3: memref<1x8x32xf32, #tpu.memory_space<vmem>>, %arg4: memref<3x32x32xf32, #tpu.memory_space<vmem>>, %arg5: memref<3x1x32xf32, #tpu.memory_space<vmem>>, %arg6: memref<1x8x32xf32, #tpu.memory_space<vmem>>) attributes {dimension_semantics = [#tpu.dimension_semantics<parallel>], iteration_bounds = array<i64: 2>, scalar_prefetch = 0 : i64, scratch_operands = 0 : i64, tpu.core_type = #tpu.core_type<tc>, window_params = [{transform_indices = @transform_0, window_bounds = array<i64: 1, 8, 32>}, {transform_indices = @transform_1, window_bounds = array<i64: 1, 8, 32>}, {transform_indices = @transform_2, window_bounds = array<i64: 1, 8, 32>}, {pipeline_mode = #tpu.pipeline_mode<synchronous>, transform_indices = @transform_3, window_bounds = array<i64: 3, 32, 32>}, {pipeline_mode = #tpu.pipeline_mode<synchronous>, transform_indices = @transform_4, window_bounds = array<i64: 3, 1, 32>}, {transform_indices = @transform_5, window_bounds = array<i64: 1, 8, 32>}]} {
    %c0 = arith.constant 0 : index
    %c0_0 = arith.constant 0 : index
    %c0_1 = arith.constant 0 : index
    %0 = vector.load %arg1[%c0, %c0_0, %c0_1] : memref<1x8x32xf32, #tpu.memory_space<vmem>>, vector<1x8x32xf32>
    %1 = vector.shape_cast %0 : vector<1x8x32xf32> to vector<8x32xf32>
    %c0_2 = arith.constant 0 : index
    %c0_3 = arith.constant 0 : index
    %c0_4 = arith.constant 0 : index
    %2 = vector.load %arg2[%c0_2, %c0_3, %c0_4] : memref<1x8x32xf32, #tpu.memory_space<vmem>>, vector<1x8x32xf32>
    %3 = vector.shape_cast %2 : vector<1x8x32xf32> to vector<8x32xf32>
    %c0_5 = arith.constant 0 : index
    %c0_6 = arith.constant 0 : index
    %c0_7 = arith.constant 0 : index
    %4 = vector.load %arg3[%c0_5, %c0_6, %c0_7] : memref<1x8x32xf32, #tpu.memory_space<vmem>>, vector<1x8x32xf32>
    %5 = vector.shape_cast %4 : vector<1x8x32xf32> to vector<8x32xf32>
    %c0_8 = arith.constant 0 : index
    %c0_9 = arith.constant 0 : index
    %c0_10 = arith.constant 0 : index
    %6 = vector.load %arg4[%c0_8, %c0_9, %c0_10] : memref<3x32x32xf32, #tpu.memory_space<vmem>>, vector<1x32x32xf32>
    %7 = vector.shape_cast %6 : vector<1x32x32xf32> to vector<32x32xf32>
    %cst = arith.constant dense<0.000000e+00> : vector<8x32xf32>
    %8 = tpu.matmul %1, %7, %cst {dimension_numbers = #tpu.dot_dimension_numbers<[1], [0], [0], [1], [0, 0, 1, 1], [], []>} : vector<8x32xf32>, vector<32x32xf32>, vector<8x32xf32> -> vector<8x32xf32>
    %c0_11 = arith.constant 0 : index
    %c0_12 = arith.constant 0 : index
    %c0_13 = arith.constant 0 : index
    %9 = vector.load %arg5[%c0_11, %c0_12, %c0_13] : memref<3x1x32xf32, #tpu.memory_space<vmem>>, vector<1x1x32xf32>
    %10 = vector.shape_cast %9 : vector<1x1x32xf32> to vector<1x32xf32>
    %11 = vector.broadcast %10 : vector<1x32xf32> to vector<8x32xf32>
    %12 = arith.addf %8, %11 : vector<8x32xf32>
    %c1 = arith.constant 1 : index
    %c0_14 = arith.constant 0 : index
    %c0_15 = arith.constant 0 : index
    %13 = vector.load %arg4[%c1, %c0_14, %c0_15] : memref<3x32x32xf32, #tpu.memory_space<vmem>>, vector<1x32x32xf32>
    %14 = vector.shape_cast %13 : vector<1x32x32xf32> to vector<32x32xf32>
    %cst_16 = arith.constant dense<0.000000e+00> : vector<8x32xf32>
    %15 = tpu.matmul %3, %14, %cst_16 {dimension_numbers = #tpu.dot_dimension_numbers<[1], [0], [0], [1], [0, 0, 1, 1], [], []>} : vector<8x32xf32>, vector<32x32xf32>, vector<8x32xf32> -> vector<8x32xf32>
    %c1_17 = arith.constant 1 : index
    %c0_18 = arith.constant 0 : index
    %c0_19 = arith.constant 0 : index
    %16 = vector.load %arg5[%c1_17, %c0_18, %c0_19] : memref<3x1x32xf32, #tpu.memory_space<vmem>>, vector<1x1x32xf32>
    %17 = vector.shape_cast %16 : vector<1x1x32xf32> to vector<1x32xf32>
    %18 = vector.broadcast %17 : vector<1x32xf32> to vector<8x32xf32>
    %19 = arith.addf %15, %18 : vector<8x32xf32>
    %c2 = arith.constant 2 : index
    %c0_20 = arith.constant 0 : index
    %c0_21 = arith.constant 0 : index
    %20 = vector.load %arg4[%c2, %c0_20, %c0_21] : memref<3x32x32xf32, #tpu.memory_space<vmem>>, vector<1x32x32xf32>
    %21 = vector.shape_cast %20 : vector<1x32x32xf32> to vector<32x32xf32>
    %cst_22 = arith.constant dense<0.000000e+00> : vector<8x32xf32>
    %22 = tpu.matmul %5, %21, %cst_22 {dimension_numbers = #tpu.dot_dimension_numbers<[1], [0], [0], [1], [0, 0, 1, 1], [], []>} : vector<8x32xf32>, vector<32x32xf32>, vector<8x32xf32> -> vector<8x32xf32>
    %c2_23 = arith.constant 2 : index
    %c0_24 = arith.constant 0 : index
    %c0_25 = arith.constant 0 : index
    %23 = vector.load %arg5[%c2_23, %c0_24, %c0_25] : memref<3x1x32xf32, #tpu.memory_space<vmem>>, vector<1x1x32xf32>
    %24 = vector.shape_cast %23 : vector<1x1x32xf32> to vector<1x32xf32>
    %25 = vector.broadcast %24 : vector<1x32xf32> to vector<8x32xf32>
    %26 = arith.addf %22, %25 : vector<8x32xf32>
    %27 = vector.shape_cast %12 : vector<8x32xf32> to vector<1x8x4x8xf32>
    %28 = tpu.transpose %27, [0, 2, 1, 3] : vector<1x8x4x8xf32> -> vector<1x4x8x8xf32>
    %29 = vector.shape_cast %28 : vector<1x4x8x8xf32> to vector<4x8x8xf32>
    %30 = vector.shape_cast %19 : vector<8x32xf32> to vector<1x8x4x8xf32>
    %31 = tpu.transpose %30, [0, 2, 1, 3] : vector<1x8x4x8xf32> -> vector<1x4x8x8xf32>
    %32 = vector.shape_cast %31 : vector<1x4x8x8xf32> to vector<4x8x8xf32>
    %33 = vector.shape_cast %26 : vector<8x32xf32> to vector<1x8x4x8xf32>
    %34 = tpu.transpose %33, [0, 2, 1, 3] : vector<1x8x4x8xf32> -> vector<1x4x8x8xf32>
    %35 = vector.shape_cast %34 : vector<1x4x8x8xf32> to vector<4x8x8xf32>
    "tpu.trace_start"() <{level = 10 : i32, message = "bqd,bkd->bqk"}> : () -> ()
    %cst_26 = arith.constant dense<0.000000e+00> : vector<4x8x8xf32>
    %36 = tpu.matmul %29, %32, %cst_26 {dimension_numbers = #tpu.dot_dimension_numbers<[2], [2], [1], [1], [0, 0, 0, 1, 1, 1], [0], [0]>} : vector<4x8x8xf32>, vector<4x8x8xf32>, vector<4x8x8xf32> -> vector<4x8x8xf32>
    "tpu.trace_stop"() : () -> ()
    %cst_27 = arith.constant dense<0xFF800000> : vector<4x8xf32>
    %37 = vector.multi_reduction <maximumf>, %36, %cst_27 [2] : vector<4x8x8xf32> to vector<4x8xf32>
    %38 = vector.shape_cast %37 : vector<4x8xf32> to vector<4x8x1xf32>
    %39 = vector.broadcast %38 : vector<4x8x1xf32> to vector<4x8x8xf32>
    %40 = arith.subf %36, %39 : vector<4x8x8xf32>
    %41 = math.exp %40 : vector<4x8x8xf32>
    %cst_28 = arith.constant dense<0.000000e+00> : vector<4x8xf32>
    %42 = vector.multi_reduction <add>, %41, %cst_28 [2] : vector<4x8x8xf32> to vector<4x8xf32>
    %43 = vector.shape_cast %42 : vector<4x8xf32> to vector<4x8x1xf32>
    %44 = tpu.reciprocal %43 {approx = true} : vector<4x8x1xf32> -> vector<4x8x1xf32>
    %45 = vector.broadcast %44 : vector<4x8x1xf32> to vector<4x8x8xf32>
    %46 = arith.mulf %41, %45 : vector<4x8x8xf32>
    "tpu.trace_start"() <{level = 10 : i32, message = "bqk,bkd->bqd"}> : () -> ()
    %cst_29 = arith.constant dense<0.000000e+00> : vector<4x8x8xf32>
    %47 = tpu.matmul %46, %35, %cst_29 {dimension_numbers = #tpu.dot_dimension_numbers<[2], [1], [1], [2], [0, 0, 0, 1, 1, 2], [0], [0]>} : vector<4x8x8xf32>, vector<4x8x8xf32>, vector<4x8x8xf32> -> vector<4x8x8xf32>
    "tpu.trace_stop"() : () -> ()
    %48 = vector.shape_cast %47 : vector<4x8x8xf32> to vector<1x4x8x8xf32>
    %49 = tpu.transpose %48, [0, 2, 1, 3] : vector<1x4x8x8xf32> -> vector<1x8x4x8xf32>
    %50 = vector.shape_cast %49 : vector<1x8x4x8xf32> to vector<1x8x32xf32>
    %c0_30 = arith.constant 0 : index
    %c0_31 = arith.constant 0 : index
    %c0_32 = arith.constant 0 : index
    %51 = vector.load %arg6[%c0_30, %c0_31, %c0_32] : memref<1x8x32xf32, #tpu.memory_space<vmem>>, vector<1x8x32xf32>
    tpu.vector_store %arg6[%c0_30, %c0_31, %c0_32], %50 {strides = array<i32>} : memref<1x8x32xf32, #tpu.memory_space<vmem>>, vector<1x8x32xf32>,
    return
  }
  func.func @transform_0(%arg0: i32) -> (i32, i32, i32) {
    %c0_i32 = arith.constant 0 : i32
    %c0_i32_0 = arith.constant 0 : i32
    %c0_i32_1 = arith.constant 0 : i32
    return %arg0, %c0_i32, %c0_i32_0 : i32, i32, i32
  }
  func.func @transform_1(%arg0: i32) -> (i32, i32, i32) {
    %c0_i32 = arith.constant 0 : i32
    %c0_i32_0 = arith.constant 0 : i32
    %c0_i32_1 = arith.constant 0 : i32
    return %arg0, %c0_i32, %c0_i32_0 : i32, i32, i32
  }
  func.func @transform_2(%arg0: i32) -> (i32, i32, i32) {
    %c0_i32 = arith.constant 0 : i32
    %c0_i32_0 = arith.constant 0 : i32
    %c0_i32_1 = arith.constant 0 : i32
    return %arg0, %c0_i32, %c0_i32_0 : i32, i32, i32
  }
  func.func @transform_3(%arg0: i32) -> (i32, i32, i32) {
    %c0_i32 = arith.constant 0 : i32
    %c0_i32_0 = arith.constant 0 : i32
    %c0_i32_1 = arith.constant 0 : i32
    %c0_i32_2 = arith.constant 0 : i32
    return %c0_i32, %c0_i32_0, %c0_i32_1 : i32, i32, i32
  }
  func.func @transform_4(%arg0: i32) -> (i32, i32, i32) {
    %c0_i32 = arith.constant 0 : i32
    %c0_i32_0 = arith.constant 0 : i32
    %c0_i32_1 = arith.constant 0 : i32
    %c0_i32_2 = arith.constant 0 : i32
    return %c0_i32, %c0_i32_0, %c0_i32_1 : i32, i32, i32
  }
  func.func @transform_5(%arg0: i32) -> (i32, i32, i32) {
    %c0_i32 = arith.constant 0 : i32
    %c0_i32_0 = arith.constant 0 : i32
    %c0_i32_1 = arith.constant 0 : i32
    return %arg0, %c0_i32, %c0_i32_0 : i32, i32, i32
  }
}

</mosaic_0001>

<bundles_post_ra>
// kernel: tpu_custom_call.1
= control target key start
LH: loop header
LB: loop body
LE: loop exit
PB: predicated region body
PF: predicated region fallthrough
CT: control target
= control target key end

     0   :  { %s2102_s0 = inlined_call_operand.hbm [shape: f32[2,8,32], index: 0, kind: input, shape index: {}]   ;;  %s2103_s1 = inlined_call_operand.hbm [shape: f32[2,8,32], index: 1, kind: input, shape index: {}]   ;;  %s2104_s2 = inlined_call_operand.hbm [shape: f32[2,8,32], index: 2, kind: input, shape index: {}]   ;;  %s2105_s3 = inlined_call_operand.hbm [shape: f32[3,32,32], index: 3, kind: input, shape index: {}]   ;;  %s2106_s4 = inlined_call_operand.vmem [shape: f32[3,1,32], index: 4, kind: input, shape index: {}]   ;;  %s2107_s5 = inlined_call_operand.hbm [shape: f32[2,8,32], index: 5, kind: output, shape index: {}]  }
   0x1   :  { %2112 = sst [smem:[#allocation18_spill]] %s2103_s1 }
   0x2   :  { %2113 = sst [smem:[#allocation19_spill]] %s2105_s3 }
   0x3   :  { %10 = vsyncpa [#allocation3], 0 }
   0x4   :  { %12 = vsyncpa [#allocation3 + $0x1], 0 }
   0x5   :  { %13 = vsyncpa [#allocation6], 0 }
   0x6   :  { %15 = vsyncpa [#allocation6 + $0x1], 0 }
   0x7   :  { %16 = vsyncpa [#allocation9], 0 }
   0x8   :  { %17 = vsyncpa [#allocation4], 0 }
   0x9   :  { %19 = vsyncpa [#allocation4 + $0x1], 0  ;;  %s1674_s18 = smov 0   ;;  %s1676_s19 = smov 0  }
   0xa   :  { %s1678_s20 = smov 0   ;;  %s1680_s21 = smov 0  }
   0xb LB: > { %2114 = sst [smem:[#allocation15_spill]] %s1631_s21  ;;  %s1695_s22 = sadd.s32 4294967295, %s1631_s21   ;;  %s1631_s21 = sphi %s1680_s21, %s2127_s21   ;;  %s1627_s20 = sphi %s1678_s20, %s2131_s20   ;;  %s1623_s19 = sphi %s1676_s19, %s2130_s19   ;;  %s1619_s18 = sphi %s1674_s18, %s2129_s18  }
   0xc   : > { %s1304_s23 = sadd.s32 4294967294, %s1631_s21   ;;  %s1699_s24 = sadd.s32 1, %s1631_s21  }
   0xd   : > { %2115 = sst [smem:[#allocation16_spill]] %s1699_s24  ;;  %s32_s25 = sadd.s32 1, %s1627_s20 }
   0xe   : > { %s29_s26 = ssub.s32 %s1631_s21, %s1699_s24  ;;  %p39_p0 = scmp.ne.s32.totalorder %s1627_s20, %s1623_s19 }
   0xf   : > { %p30_p1 = scmp.eq.s32.totalorder %s29_s26, 0  ;;  %p40_p2 = scmp.eq.s32.totalorder %s1631_s21, 0 }
  0x10   : > { %p45_p3 = scmp.ne.s32.totalorder %s1623_s19, %s1619_s18  ;;  %p163_p4 = scmp.eq.s32.totalorder %s1695_s22, 1 }
  0x11   : > { %s1711_s27 = scalar_select %p30_p1, %s1627_s20, %s32_s25  }
  0x12   : > { %p41_p5 = por %p40_p2, %p39_p0  ;;  %p1713_p6 = por %p163_p4, %p39_p0 }
  0x13   : > { %2116 = sst [smem:[#allocation17_spill]] %s1711_s27  ;;  %p169_p7 = scmp.eq.s32.totalorder %s1304_s23, 1 }
  0x14   : > { %p1372_p9 = scmp.lt.s32.totalorder %s1631_s21, 2  ;;  %s2108_s30 = sand.u32 1, %s1627_s20  }
  0x15   : > { %p1722_p10 = por %p169_p7, %p45_p3  ;;  %s1729_s6 = sshll.u32 %s2108_s30, 3 }
  0x16   : > { %s1732_s7 = sshll.u32 %s1631_s21, 3  ;;  %p1734_p11 = pnand %p1372_p9, %p41_p5 }
  0x17   : > { %s225_s9 = sand.u32 1, %s1631_s21   ;;  %s2120_s1 = sld [smem:[#allocation18_spill]] }
  0x18   : > { %s229_s14 = scalar_lea.vmem [#allocation5], %s1729_s6  ;;  %s1744_s16 = scalar_lea.sflag [#allocation6], %s225_s9 }
  0x19   : > { %s237_s15 = sshll.u32 %s229_s14, 4  ;;  %p1441_p13 = pneg %p1734_p11  ;;  %s238_s15 = int_to_ptr.vmem [resolvable:$true] %s237_s15 }
  0x1d   : > { %s233_s12 = scalar_lea.hbm %s2120_s1, %s1732_s7  ;;  %s1444_s10 = scalar_lea.hbm %s2120_s1, 16 }
  0x1e   : > { %s235_s13 = sshll.u32 %s233_s12, 4  ;;  %s236_s13 = int_to_ptr.hbm [resolvable:$true] %s235_s13 }
  0x1f   : > { %s1437_s17 = sshra.s32 %s236_s13, 4  ;;  %s1438_s17 = int_to_ptr.hbm [resolvable:$true] %s1437_s17 }
  0x20   : > { %s1439_s23 = scalar_lea.hbm %s1438_s17, 8  ;;  %p1445_p2 = scmp.lt.s32.totalorder %s1438_s17, %s2120_s1 }
  0x21   : > { %p1440_p12 = scmp.ne.s32.totalorder %s1438_s17, %s1439_s23  ;;  %p1446_p4 = scmp.lt.s32.totalorder %s1444_s10, %s1439_s23 }
  0x23   : > { %p1442_p0 = pnand %p1441_p13, %p1440_p12  ;;  %p1447_p5 = por %p1446_p4, %p1445_p2 }
  0x25   : > { %p1443_p1 = pneg %p1442_p0 }
  0x27   : > { %p1448_p7 = pnand %p1447_p5, %p1443_p1 }
  0x29   : > { %1451 = shalt.err (!%p1448_p7)
}
  0x2a   : > { %1363 = dma.hbm_to_vmem [thread:$0]  (!%p1734_p11), %s236_s13, 128, %s238_s15, %s1744_s16  }
  0x2b   : > { %p46_p9 = scmp.eq.s32.totalorder %s1695_s22, 0  ;;  %p1305_p12 = scmp.ge.s32.totalorder %s1631_s21, 1 }
  0x2c   : > { %p176_p0 = scmp.lt.s32.totalorder %s1631_s21, 3  ;;  %s2121_s3 = sld [smem:[#allocation19_spill]] }
  0x2d   : > { %p1771_p1 = por %p46_p9, %p45_p3  ;;  %s1633_s13 = smov [#allocation8]  }
  0x2e   : > { %p1775_p2 = pnand %p1305_p12, %p176_p0  ;;  %s189_s15 = sshll.u32 %s1633_s13, 4  ;;  %s190_s15 = int_to_ptr.vmem [resolvable:$true] %s189_s15 }
  0x2f   : > { %s214_s11 = scalar_lea.hbm %s2102_s0, %s1732_s7  ;;  %s210_s12 = scalar_lea.vmem [#allocation2], %s1729_s6 }
  0x30   : > { %p1353_p4 = pneg %p1775_p2  ;;  %s218_s9 = sshll.u32 %s210_s12, 4  ;;  %s219_s9 = int_to_ptr.vmem [resolvable:$true] %s218_s9 }
  0x31   : > { %s216_s14 = sshll.u32 %s214_s11, 4  ;;  %s1634_s30 = smov 128   ;;  %s217_s14 = int_to_ptr.hbm [resolvable:$true] %s216_s14 }
  0x32   : > { %s187_s17 = sshll.u32 %s2121_s3, 4  ;;  %p1354_p5 = pnand %p1353_p4, %p46_p9  ;;  %s188_s17 = int_to_ptr.hbm [resolvable:$true] %s187_s17 }
  0x33   : > { %s1635_s1 = smov 8   ;;  %s2124_s3 = sand.u32 1, %s1627_s20  }
  0x34   : > { %1356 = dma.hbm_to_vmem [thread:$0]  (!%p1354_p5), %s188_s17, 1536, %s190_s15, [#allocation9], %s1634_s30, %s1634_s30, %s1635_s1  }
  0x35   : > { %s207_s13 = scalar_lea.sflag [#allocation3], %s2124_s3  ;;  %s1497_s27 = sshra.s32 %s217_s14, 4  ;;  %s1498_s27 = int_to_ptr.hbm [resolvable:$true] %s1497_s27 }
  0x36   : > { %s1499_s24 = scalar_lea.hbm %s1498_s27, 8  ;;  %s1504_s12 = scalar_lea.hbm %s2102_s0, 16 }
  0x37   : > { %p1500_p3 = scmp.ne.s32.totalorder %s1498_s27, %s1499_s24  ;;  %p1505_p0 = scmp.lt.s32.totalorder %s1498_s27, %s2102_s0 }
  0x38   : > { %p1506_p4 = scmp.lt.s32.totalorder %s1504_s12, %s1499_s24 }
  0x39   : > { %p1502_p7 = pnand %p1500_p3, %p1441_p13 }
  0x3a   : > { %p1507_p5 = por %p1506_p4, %p1505_p0 }
  0x3b   : > { %p1503_p12 = pneg %p1502_p7 }
  0x3d   : > { %p1508_p8 = pnand %p1507_p5, %p1503_p12 }
  0x3f   : > { %1511 = shalt.err (!%p1508_p8)
}
  0x40   : > { %1360 = dma.hbm_to_vmem [thread:$0]  (!%p1734_p11), %s217_s14, 128, %s219_s9, %s207_s13  }
  0x41   : > { %s252_s30 = scalar_lea.hbm %s2104_s2, %s1732_s7  ;;  %s248_s15 = scalar_lea.vmem [#allocation7], %s1729_s6 }
  0x42   : > { %s254_s17 = sshll.u32 %s252_s30, 4  ;;  %s256_s26 = sshll.u32 %s248_s15, 4  ;;  %s255_s17 = int_to_ptr.hbm [resolvable:$true] %s254_s17  ;;  %s257_s26 = int_to_ptr.vmem [resolvable:$true] %s256_s26 }
  0x43   : > { %s1527_s21 = sshra.s32 %s255_s17, 4  ;;  %s1534_s9 = scalar_lea.hbm %s2104_s2, 16  ;;  %s1528_s21 = int_to_ptr.hbm [resolvable:$true] %s1527_s21 }
  0x44   : > { %s1529_s24 = scalar_lea.hbm %s1528_s21, 8  ;;  %p1535_p12 = scmp.lt.s32.totalorder %s1528_s21, %s2104_s2 }
  0x45   : > { %p1530_p3 = scmp.ne.s32.totalorder %s1528_s21, %s1529_s24  ;;  %p1536_p0 = scmp.lt.s32.totalorder %s1534_s9, %s1529_s24 }
  0x47   : > { %p1532_p8 = pnand %p1530_p3, %p1441_p13  ;;  %p1537_p4 = por %p1536_p0, %p1535_p12 }
  0x49   : > { %p1533_p7 = pneg %p1532_p8 }
  0x4b   : > { %p1538_p5 = pnand %p1537_p4, %p1533_p7 }
  0x4d   : > { %1541 = shalt.err (!%p1538_p5)
}
  0x4e   : > { %1366 = dma.hbm_to_vmem [thread:$0]  (!%p1734_p11), %s255_s17, 128, %s257_s26, %s1744_s16  }
  0x4f   : > { %265 = sbr.rel (%p1775_p2) target bundleno = 1050 (0x41a), region = 40  ;;  %s1821_s6 = sand.u32 (!%p1775_p2), 1, %s1623_s19  }
  0x50   : > { %s1824_s7 = sshll.u32 (!%p1775_p2), %s1821_s6, 3  ;;  %s268_s12 = scalar_lea.sflag (!%p1775_p2), [#allocation3], %s1821_s6 }
  0x51   : > { %s271_s11 = scalar_lea.vmem (!%p1775_p2), [#allocation2], %s1824_s7 }
  0x54   : > { %1602 = dma.done.wait (%p1771_p1), %s268_s12, 128  }
  0x55   : > { %1604 = vsyncadd (%p1771_p1), %s268_s12, 4294967168  ;;  %s277_s8 = sand.u32 1, %s1695_s22   ;;  %s281_s25 = scalar_lea.vmem [#allocation5], %s1824_s7 }
  0x56   : > { %s278_s16 = scalar_lea.sflag [#allocation6], %s277_s8 }
  0x57   : > { %1606 = dma.done.wait (%p1771_p1), %s278_s16, 256  }
  0x58   : > { %1608 = vsyncadd (%p1771_p1), %s278_s16, 4294967040  ;;  %s291_s1 = scalar_lea.vmem [#allocation7], %s1824_s7 }
  0x59   : > { %1610 = dma.done.wait (%p46_p9), [#allocation9], 1536  }
  0x5a   : > { %1612 = vsyncadd (%p46_p9), [#allocation9], 4294965760  ;;  %v340_v0 = vld [vmem:[#allocation8 + $0x18] sm:$0xff]  ;;  %v339_v2 = vld [vmem:[#allocation8 + $0x10] sm:$0xff]  ;;  %vm345_vm0 = vcmask 261120   ;;  %s1636_s15 = smov 104  }
  0x5b   : > { %v373_v1 = vld [vmem:[#allocation8 + $0x38] sm:$0xff]  ;;  %361 = vmatpush.msra.mxu0 %v340_v0  ;;  %v372_v3 = vld [vmem:[#allocation8 + $0x30] sm:$0xff]  ;;  %v338_v4 = vld [vmem:[#allocation8 + $0x8] sm:$0xff]  ;;  %s1637_s26 = smov 120   ;;  %s1638_s21 = smov 112   ;;  %vm446_vm1 = vcmask 1047556  }
  0x5c   : > { %394 = vmatpush.msra.mxu1 %v373_v1  ;;  %v371_v5 = vld [vmem:[#allocation8 + $0x28] sm:$0xff]  ;;  %v337_v6 = vld [vmem:[#allocation8] sm:$0xff]  ;;  %v334_v8 = vld [vmem:[%s271_s11] sm:$0xff]  ;;  %v1639_v17 = vmov 1983009808   ;;  %vm796_vm2 = vcmask 64512  }
  0x5d   : > { %362 = vmatpush.msra.mxu0 %v339_v2  ;;  %v370_v7 = vld [vmem:[#allocation8 + $0x20] sm:$0xff]  ;;  %v1418_v10 = vld [vmem:[%s2106_s4] ss:$0 sm:$0xff]  ;;  %v1419_v11 = vld [vmem:[%s2106_s4 + $0x1] ss:$0 sm:$0xff]  ;;  %v451_v18 = vunpack.c.l.s4 %v1639_v17  ;;  %s1641_s10 = smov 24  }
  0x5e   : > { %395 = vmatpush.msra.mxu1 %v372_v3  ;;  %v335_v9 = vld [vmem:[%s281_s25] sm:$0xff]  ;;  %v1640_v30 = vmov 1934713408   ;;  %s1642_s9 = smov 16   ;;  %s1643_s14 = smov 8   ;;  %vm1160_vm3 = vcmask 130048  }
  0x5f   : > { %363 = vmatpush.msra.mxu0 %v338_v4  ;;  %v1858_v26 = vunpack.c.0.s8 %v451_v18  ;;  %v475_v31 = vunpack.c.l.s4 %v1640_v30  ;;  %s1338_s13 = sshll.u32 %s1695_s22, 3  ;;  %s333_s16 = scalar_lea.vmem [#allocation10], %s1824_s7  ;;  %vm1162_vm4 = vcmask 195584  }
  0x60   : > { %396 = vmatpush.msra.mxu1 %v371_v5  ;;  %s1176_s8 = scalar_lea.hbm %s2107_s5, %s1338_s13  ;;  %s1178_s25 = sshll.u32 %s333_s16, 4  ;;  %s1179_s25 = int_to_ptr.vmem [resolvable:$true] %s1178_s25 }
  0x61   : > { %364 = vmatpush.msra.mxu0 %v337_v6  ;;  %v1867_v39 = vunpack.c.0.s8 %v475_v31  ;;  %s1166_s22 = scalar_lea.sflag [#allocation4], %s1821_s6  ;;  %s1577_s17 = scalar_lea.hbm %s2107_s5, 16 }
  0x62   : > { %397 = vmatpush.msra.mxu1 %v370_v7  ;;  %1320 = vmatmul.msk.f32.vlgmr.msra.gmra.mxu0 %vm345_vm0, %v334_v8 }
  0x63   : > { %1322 = vmatmul.msk.f32.vlgmr.msra.gmra.mxu1 %vm345_vm0, %v335_v9  ;;  %v406_v9 = vld [vmem:[#allocation8 + $0x58] sm:$0xff] }
  0x64   : > { %427 = vmatpush.msra.mxu2 %v406_v9 }
  0xdf   : > { %v366_v12 = vpop.f32.mrf.mxu0 }
  0xe0   : > { %v399_v13 = vpop.f32.mrf.mxu1  ;;  %v367_v14 = vadd.f32 %v1418_v10, %v366_v12  ;;  %v405_v10 = vld [vmem:[#allocation8 + $0x50] sm:$0xff] }
  0xe1   : > { %v400_v15 = vadd.f32 %v1419_v11, %v399_v13  ;;  %428 = vmatpush.msra.mxu2 %v405_v10 }
  0xe2   : > { %439 = vrot.lane.b32.xlu2 %v367_v14, %s1638_s21  ;;  %v448_v24 = vrot.slane %v367_v14, 4 }
  0xe3   : > { %563 = vrot.lane.b32.xlu1 %v400_v15, %s1636_s15  ;;  %557 = vrot.lane.b32.xlu0 %v400_v15, %s1637_s26  ;;  %v568_v37 = vrot.slane %v400_v15, 4 }
  0xea   : > { %442 = vrot.lane.b32.xlu2 %v367_v14, %s1636_s15 }
  0xeb   : > { %560 = vrot.lane.b32.xlu0 %v400_v15, %s1638_s21  ;;  %436 = vrot.lane.b32.xlu1 %v367_v14, %s1637_s26 }
 0x13c   : > { %v440_v16 = vpop.permute.xlu2 %439 }
 0x13d   : > { %v445_v19 = vrot.slane %v440_v16, 4  ;;  %v449_v32 = vsel %vm446_vm1, %v440_v16, %v448_v24 }
 0x13e   : > { %v457_v38 = vperm.slane %v449_v32, %v1858_v26 }
 0x13f   : > { %v447_v27 = vsel %vm446_vm1, %v445_v19, %v367_v14  ;;  %v404_v19 = vld [vmem:[#allocation8 + $0x48] sm:$0xff] }
 0x140   : > { %v453_v34 = vperm.slane %v447_v27, %v1858_v26  ;;  %v484_v57 = vrot.slane %v457_v38, 4  ;;  %429 = vmatpush.msra.mxu2 %v404_v19 }
 0x142   : > { %v472_v49 = vrot.slane %v453_v34, 4 }
 0x144   : > { %v443_v28 = vpop.permute.xlu2 %442 }
 0x145   : > { %v458_v35 = vrot.slane %v443_v28, 4 }
 0x155   : > { %v564_v20 = vpop.permute.xlu1 %563  ;;  %v558_v21 = vpop.permute.xlu0 %557 }
 0x156   : > { %v578_v22 = vrot.slane %v564_v20, 4  ;;  %v580_v23 = vrot.slane %v558_v21, 4 }
 0x158   : > { %v581_v25 = vsel %vm446_vm1, %v564_v20, %v580_v23  ;;  %v579_v29 = vsel %vm446_vm1, %v578_v22, %v558_v21 }
 0x159   : > { %v589_v33 = vperm.slane %v581_v25, %v1858_v26  ;;  %v585_v36 = vperm.slane %v579_v29, %v1858_v26  ;;  %v403_v29 = vld [vmem:[#allocation8 + $0x40] sm:$0xff] }
 0x15a   : > { %430 = vmatpush.msra.mxu2 %v403_v29 }
 0x15b   : > { %v602_v46 = vrot.slane %v589_v33, 4  ;;  %v590_v50 = vrot.slane %v585_v36, 4 }
 0x15d   : > { %v561_v40 = vpop.permute.xlu0 %560  ;;  %v437_v41 = vpop.permute.xlu1 %436 }
 0x15e   : > { %v566_v42 = vrot.slane %v561_v40, 4  ;;  %v569_v43 = vsel %vm446_vm1, %v561_v40, %v568_v37  ;;  %v459_v44 = vsel %vm446_vm1, %v458_v35, %v437_v41  ;;  %v460_v45 = vrot.slane %v437_v41, 4 }
 0x15f   : > { %v577_v47 = vperm.slane %v569_v43, %v1858_v26  ;;  %v465_v48 = vperm.slane %v459_v44, %v1858_v26 }
 0x160   : > { %v567_v51 = vsel %vm446_vm1, %v566_v42, %v400_v15  ;;  %v461_v52 = vsel %vm446_vm1, %v443_v28, %v460_v45 }
 0x161   : > { %v573_v53 = vperm.slane %v567_v51, %v1858_v26  ;;  %v603_v54 = vsel %vm446_vm1, %v602_v46, %v577_v47  ;;  %v604_v55 = vrot.slane %v577_v47, 4  ;;  %v469_v56 = vperm.slane %v461_v52, %v1858_v26 }
 0x162   : > { %v609_v58 = vperm.slane %v603_v54, %v1867_v39  ;;  %v470_v59 = vrot.slane %v465_v48, 4  ;;  %v473_v60 = vsel %vm446_vm1, %v465_v48, %v472_v49 }
 0x163   : > { %v591_v61 = vsel %vm446_vm1, %v590_v50, %v573_v53  ;;  %v592_v62 = vrot.slane %v573_v53, 4  ;;  %v605_v63 = vsel %vm446_vm1, %v589_v33, %v604_v55  ;;  %v481_v0 = vperm.slane %v473_v60, %v1867_v39 }
 0x164   : > { %v597_v1 = vperm.slane %v591_v61, %v1867_v39  ;;  %v613_v2 = vperm.slane %v605_v63, %v1867_v39  ;;  %v618_v3 = vrot.slane %v609_v58, 4  ;;  %v471_v4 = vsel %vm446_vm1, %v470_v59, %v453_v34  ;;  %v336_v34 = vld [vmem:[%s291_s1] sm:$0xff]  ;;  %s1180_s1 = sshll.u32 %s1176_s8, 4  ;;  %s1181_s1 = int_to_ptr.hbm [resolvable:$true] %s1180_s1 }
 0x165   : > { %v593_v5 = vsel %vm446_vm1, %v585_v36, %v592_v62  ;;  %v477_v6 = vperm.slane %v471_v4, %v1867_v39  ;;  %v482_v7 = vrot.slane %v469_v56, 4  ;;  %v485_v8 = vsel %vm446_vm1, %v469_v56, %v484_v57  ;;  %1324 = vmatmul.msk.f32.vlgmr.msra.gmra.mxu2 %vm345_vm0, %v336_v34  ;;  %s1571_s23 = sshra.s32 %s1181_s1, 4  ;;  %s1572_s23 = int_to_ptr.hbm [resolvable:$true] %s1571_s23 }
 0x166   : > { %v601_v11 = vperm.slane %v593_v5, %v1867_v39  ;;  %v614_v12 = vrot.slane %v597_v1, 4  ;;  %v619_v13 = vsel %vm446_vm1, 0.0, %v618_v3  ;;  %v620_v14 = vrot.slane %v613_v2, 4  ;;  %s1573_s3 = scalar_lea.hbm %s1572_s23, 8  ;;  %p1578_p1 = scmp.lt.s32.totalorder %s1572_s23, %s2107_s5 }
 0x167   : > { %v483_v15 = vsel %vm446_vm1, %v482_v7, %v457_v38  ;;  %v493_v16 = vperm.slane %v485_v8, %v1867_v39  ;;  %v494_v17 = vrot.slane %v477_v6, 4  ;;  %v496_v18 = vrot.slane %v481_v0, 4  ;;  %p1574_p11 = scmp.ne.s32.totalorder %s1572_s23, %s1573_s3  ;;  %p1579_p2 = scmp.lt.s32.totalorder %s1577_s17, %s1573_s3 }
 0x168   : > { %v616_v20 = vrot.slane %v601_v11, 4  ;;  %v621_v21 = vsel %vm446_vm1, 0.0, %v620_v14  ;;  %v633_v22 = vsel %vm446_vm1, %v620_v14, %v609_v58  ;;  %v489_v23 = vperm.slane %v483_v15, %v1867_v39 }
 0x169   : > { %v637_v24 = vperm.slane %v633_v22, %v1858_v26  ;;  %v638_v25 = vrot.slane %v621_v21, 4  ;;  %v495_v27 = vsel %vm446_vm1, 0.0, %v494_v17  ;;  %v497_v28 = vsel %vm446_vm1, 0.0, %v496_v18  ;;  %p1575_p13 = pnand %p1574_p11, %p1713_p6  ;;  %p1580_p3 = por %p1579_p2, %p1578_p1 }
 0x16a   : > { %v617_v30 = vsel %vm446_vm1, 0.0, %v616_v20  ;;  %v498_v31 = vrot.slane %v489_v23, 4  ;;  %v500_v32 = vrot.slane %v493_v16, 4  ;;  %v502_v33 = vsel %vm446_vm1, %v496_v18, %v477_v6 }
 0x16b   : > { %v639_v35 = vsel %vm446_vm1, %v638_v25, %v619_v13  ;;  %v506_v36 = vperm.slane %v502_v33, %v1858_v26  ;;  %v507_v37 = vrot.slane %v497_v28, 4  ;;  %v615_v38 = vsel %vm446_vm1, 0.0, %v614_v12  ;;  %p1576_p9 = pneg %p1575_p13 }
 0x16c   : > { %v501_v40 = vsel %vm446_vm1, 0.0, %v500_v32  ;;  %v513_v41 = vsel %vm446_vm1, %v500_v32, %v489_v23  ;;  %v622_v42 = vsel %vm446_vm1, %v616_v20, %v597_v1  ;;  %v627_v43 = vrot.slane %v617_v30, 4 }
 0x16d   : > { %v518_v44 = vrot.slane %v501_v40, 4  ;;  %v626_v45 = vperm.slane %v622_v42, %v1858_v26  ;;  %v643_v46 = vperm.slane %v639_v35, %v1858_v26  ;;  %v658_v47 = vrot.slane %v637_v24, 4  ;;  %p1581_p8 = pnand %p1580_p3, %p1576_p9 }
 0x16e   : > { %v628_v48 = vsel %vm446_vm1, %v627_v43, %v615_v38  ;;  %v499_v49 = vsel %vm446_vm1, 0.0, %v498_v31  ;;  %v508_v50 = vsel %vm446_vm1, %v507_v37, %v495_v27  ;;  %v517_v51 = vperm.slane %v513_v41, %v1858_v26  ;;  %v1420_v41 = vld [vmem:[%s2106_s4 + $0x2] ss:$0 sm:$0xff] }
 0x16f   : > { %v632_v52 = vperm.slane %v628_v48, %v1858_v26  ;;  %v646_v53 = vrot.slane %v626_v45, 4  ;;  %v659_v54 = vsel %vm446_vm1, %v643_v46, %v658_v47  ;;  %v656_v55 = vrot.slane %v643_v46, 4 }
 0x170   : > { %v667_v56 = vperm.slane %v659_v54, %v1867_v39  ;;  %v512_v57 = vperm.slane %v508_v50, %v1858_v26  ;;  %v519_v58 = vsel %vm446_vm1, %v518_v44, %v499_v49  ;;  %v526_v59 = vrot.slane %v506_v36, 4 }
 0x171   : > { %v647_v60 = vsel %vm446_vm1, %v632_v52, %v646_v53  ;;  %v644_v61 = vrot.slane %v632_v52, 4  ;;  %v657_v62 = vsel %vm446_vm1, %v656_v55, %v637_v24  ;;  %v523_v63 = vperm.slane %v519_v58, %v1858_v26 }
 0x172   : > { %v655_v0 = vperm.slane %v647_v60, %v1867_v39  ;;  %v672_v1 = vrot.slane %v667_v56, 4  ;;  %v663_v2 = vperm.slane %v657_v62, %v1867_v39  ;;  %v527_v3 = vsel %vm446_vm1, %v512_v57, %v526_v59 }
 0x173   : > { %v645_v4 = vsel %vm446_vm1, %v644_v61, %v626_v45  ;;  %v535_v5 = vperm.slane %v527_v3, %v1867_v39  ;;  %v538_v6 = vrot.slane %v517_v51, 4  ;;  %v524_v7 = vrot.slane %v512_v57, 4 }
 0x174   : > { %v673_v8 = vsel %vm446_vm1, %v672_v1, %v655_v0  ;;  %v651_v9 = vperm.slane %v645_v4, %v1867_v39  ;;  %v668_v10 = vrot.slane %v663_v2, 4  ;;  %v674_v11 = vrot.slane %v655_v0, 4 }
 0x175   : > { %1329 = vmatpush.xpose.msk.msrb.mxu0 %vm796_vm2, %v673_v8  ;;  %v539_v12 = vsel %vm446_vm1, %v523_v63, %v538_v6  ;;  %v536_v13 = vrot.slane %v523_v63, 4  ;;  %v554_v14 = vrot.slane %v535_v5, 4  ;;  %v525_v19 = vsel %vm446_vm1, %v524_v7, %v506_v36 }
 0x176   : > { %v669_v15 = vsel %vm446_vm1, %v668_v10, %v651_v9  ;;  %v675_v16 = vsel %vm446_vm1, %v667_v56, %v674_v11  ;;  %v547_v17 = vperm.slane %v539_v12, %v1867_v39  ;;  %v670_v18 = vrot.slane %v651_v9, 4 }
 0x177   : > { %1325 = vmatpush.xpose.msk.msra.mxu3 %vm796_vm2, %v669_v15  ;;  %1331 = vmatpush.xpose.msk.msrb.mxu1 %vm796_vm2, %v675_v16  ;;  %v537_v20 = vsel %vm446_vm1, %v536_v13, %v517_v51  ;;  %v531_v27 = vperm.slane %v525_v19, %v1867_v39 }
 0x178   : > { %v552_v21 = vrot.slane %v547_v17, 4  ;;  %v671_v22 = vsel %vm446_vm1, %v663_v2, %v670_v18  ;;  %v543_v23 = vperm.slane %v537_v20, %v1867_v39  ;;  %v555_v24 = vsel %vm446_vm1, %v547_v17, %v554_v14 }
 0x179   : > { %v550_v30 = vrot.slane %v531_v27, 4 }
 0x17a   : > { %v553_v25 = vsel %vm446_vm1, %v552_v21, %v535_v5  ;;  %v548_v28 = vrot.slane %v543_v23, 4  ;;  %1332 = vmatmul.msk.f32.vlgmr.msrb.gmra.mxu1 %vm796_vm2, %v555_v24 }
 0x17b   : > { %1327 = vmatpush.xpose.msk.msrb.mxu3 %vm796_vm2, %v671_v22  ;;  %1330 = vmatmul.msk.f32.vlgmr.msrb.gmra.mxu0 %vm796_vm2, %v553_v25  ;;  %v551_v31 = vsel %vm446_vm1, %v543_v23, %v550_v30 }
 0x17c   : > { %v549_v29 = vsel %vm446_vm1, %v548_v28, %v531_v27 }
 0x17d   : > { %1326 = vmatmul.msk.f32.vlgmr.msra.gmra.mxu3 %vm796_vm2, %v549_v29 }
 0x185   : > { %1328 = vmatmul.msk.f32.vlgmr.msrb.gmra.mxu3 %vm796_vm2, %v551_v31 }
 0x1e8   : > { %v432_v42 = vpop.f32.mrf.mxu2 }
 0x1e9   : > { %v433_v43 = vadd.f32 %v1420_v41, %v432_v42 }
 0x1eb   : > { %v688_v8 = vrot.slane %v433_v43, 4 }
 0x1f7   : > { %v898_v34 = vpop.f32.mrf.mxu1 }
 0x1f8   : > { %v872_v32 = vpop.f32.mrf.mxu0  ;;  %v910_v36 = vsel %vm796_vm2, %v898_v34, -inf }
 0x1f9   : > { %v907_v33 = vsel %vm796_vm2, %v872_v32, -inf }
 0x1fa   : > { %908 = vmax.xlane.f32.xlu2 %v907_v33 }
 0x200   : > { %v820_v35 = vpop.f32.mrf.mxu3 }
 0x201   : > { %v901_v37 = vsel %vm796_vm2, %v820_v35, -inf }
 0x202   : > { %911 = vmax.xlane.f32.xlu2 %v910_v36  ;;  %902 = vmax.xlane.f32.xlu0 %v901_v37 }
 0x208   : > { %v846_v38 = vpop.f32.mrf.mxu3 }
 0x209   : > { %v904_v40 = vsel %vm796_vm2, %v846_v38, -inf }
 0x20a   : > { %905 = vmax.xlane.f32.xlu1 %v904_v40 }
 0x216   : > { %677 = vrot.lane.b32.xlu0 %v433_v43, %s1637_s26 }
 0x21a   : > { %683 = vrot.lane.b32.xlu2 %v433_v43, %s1636_s15 }
 0x223   : > { %680 = vrot.lane.b32.xlu1 %v433_v43, %s1638_s21 }
 0x26d   : > { %v909_v44 = vpop.xlane.xlu2 %908 }
 0x26e   : > { %v915_v45 = vsub.f32 %v872_v32, %v909_v44 }
 0x270   : > { %v921_v46 = vmul.f32 1.442695, %v915_v45 }
 0x272   : > { %1421 = vpow2.f32 %v921_v46 }
 0x275   : > { %v903_v47 = vpop.xlane.xlu0 %902  ;;  %v912_v48 = vpop.xlane.xlu2 %911 }
 0x276   : > { %v913_v49 = vsub.f32 %v820_v35, %v903_v47  ;;  %v916_v52 = vsub.f32 %v898_v34, %v912_v48 }
 0x278   : > { %v1962_v50 = vpop.eup %1421  ;;  %v917_v51 = vmul.f32 1.442695, %v913_v49  ;;  %v923_v54 = vmul.f32 1.442695, %v916_v52 }
 0x279   : > { %v931_v53 = vsel %vm796_vm2, %v1962_v50, 0.0 }
 0x27a   : > { %932 = vadd.xlane.f32.xlu2 %v931_v53  ;;  %1423 = vpow2.f32 %v917_v51 }
 0x27b   : > { %1425 = vpow2.f32 %v923_v54 }
 0x27d   : > { %v906_v55 = vpop.xlane.xlu1 %905  ;;  %v684_v0 = vpop.permute.xlu2 %683 }
 0x27e   : > { %v914_v56 = vsub.f32 %v846_v38, %v906_v55  ;;  %v698_v3 = vrot.slane %v684_v0, 4 }
 0x280   : > { %v919_v57 = vmul.f32 1.442695, %v914_v56  ;;  %v1966_v58 = vpop.eup %1423 }
 0x281   : > { %v925_v59 = vsel %vm796_vm2, %v1966_v58, 0.0  ;;  %v1970_v60 = vpop.eup %1425 }
 0x282   : > { %1427 = vpow2.f32 %v919_v57  ;;  %926 = vadd.xlane.f32.xlu0 %v925_v59  ;;  %v934_v1 = vsel %vm796_vm2, %v1970_v60, 0.0 }
 0x288   : > { %v1972_v61 = vpop.eup %1427  ;;  %v678_v62 = vpop.permute.xlu0 %677 }
 0x289   : > { %v928_v63 = vsel %vm796_vm2, %v1972_v61, 0.0  ;;  %v700_v2 = vrot.slane %v678_v62, 4  ;;  %v699_v5 = vsel %vm446_vm1, %v698_v3, %v678_v62 }
 0x28a   : > { %929 = vadd.xlane.f32.xlu1 %v928_v63  ;;  %935 = vadd.xlane.f32.xlu0 %v934_v1  ;;  %v705_v7 = vperm.slane %v699_v5, %v1858_v26 }
 0x28b   : > { %v701_v4 = vsel %vm446_vm1, %v684_v0, %v700_v2 }
 0x28c   : > { %v709_v6 = vperm.slane %v701_v4, %v1858_v26  ;;  %v710_v13 = vrot.slane %v705_v7, 4 }
 0x28e   : > { %v722_v9 = vrot.slane %v709_v6, 4 }
 0x295   : > { %v681_v10 = vpop.permute.xlu1 %680 }
 0x296   : > { %v686_v11 = vrot.slane %v681_v10, 4  ;;  %v689_v12 = vsel %vm446_vm1, %v681_v10, %v688_v8 }
 0x297   : > { %v697_v14 = vperm.slane %v689_v12, %v1858_v26 }
 0x298   : > { %v687_v15 = vsel %vm446_vm1, %v686_v11, %v433_v43 }
 0x299   : > { %v693_v16 = vperm.slane %v687_v15, %v1858_v26  ;;  %v723_v17 = vsel %vm446_vm1, %v722_v9, %v697_v14  ;;  %v724_v18 = vrot.slane %v697_v14, 4 }
 0x29a   : > { %v729_v19 = vperm.slane %v723_v17, %v1867_v39 }
 0x29b   : > { %v711_v20 = vsel %vm446_vm1, %v710_v13, %v693_v16  ;;  %v712_v21 = vrot.slane %v693_v16, 4  ;;  %v725_v22 = vsel %vm446_vm1, %v709_v6, %v724_v18 }
 0x29c   : > { %v717_v23 = vperm.slane %v711_v20, %v1867_v39  ;;  %v733_v24 = vperm.slane %v725_v22, %v1867_v39  ;;  %v738_v28 = vrot.slane %v729_v19, 4 }
 0x29d   : > { %v713_v25 = vsel %vm446_vm1, %v705_v7, %v712_v21 }
 0x29e   : > { %v721_v27 = vperm.slane %v713_v25, %v1867_v39  ;;  %v740_v29 = vrot.slane %v733_v24, 4  ;;  %v734_v30 = vrot.slane %v717_v23, 4  ;;  %v739_v37 = vsel %vm446_vm1, 0.0, %v738_v28 }
 0x2a0   : > { %v736_v31 = vrot.slane %v721_v27, 4  ;;  %v741_v32 = vsel %vm446_vm1, 0.0, %v740_v29  ;;  %v753_v33 = vsel %vm446_vm1, %v740_v29, %v729_v19  ;;  %v735_v44 = vsel %vm446_vm1, 0.0, %v734_v30 }
 0x2a1   : > { %v757_v34 = vperm.slane %v753_v33, %v1858_v26  ;;  %v758_v35 = vrot.slane %v741_v32, 4 }
 0x2a2   : > { %v737_v36 = vsel %vm446_vm1, 0.0, %v736_v31  ;;  %v742_v38 = vsel %vm446_vm1, %v736_v31, %v717_v23 }
 0x2a3   : > { %v747_v40 = vrot.slane %v737_v36, 4  ;;  %v759_v41 = vsel %vm446_vm1, %v758_v35, %v739_v37  ;;  %v746_v42 = vperm.slane %v742_v38, %v1858_v26  ;;  %v778_v43 = vrot.slane %v757_v34, 4 }
 0x2a4   : > { %v763_v45 = vperm.slane %v759_v41, %v1858_v26 }
 0x2a5   : > { %v748_v46 = vsel %vm446_vm1, %v747_v40, %v735_v44  ;;  %v766_v47 = vrot.slane %v746_v42, 4 }
 0x2a6   : > { %v752_v48 = vperm.slane %v748_v46, %v1858_v26  ;;  %v779_v49 = vsel %vm446_vm1, %v763_v45, %v778_v43  ;;  %v776_v51 = vrot.slane %v763_v45, 4 }
 0x2a7   : > { %v787_v52 = vperm.slane %v779_v49, %v1867_v39 }
 0x2a8   : > { %v767_v53 = vsel %vm446_vm1, %v752_v48, %v766_v47  ;;  %v764_v54 = vrot.slane %v752_v48, 4  ;;  %v777_v55 = vsel %vm446_vm1, %v776_v51, %v757_v34 }
 0x2a9   : > { %v775_v56 = vperm.slane %v767_v53, %v1867_v39  ;;  %v792_v57 = vrot.slane %v787_v52, 4  ;;  %v783_v59 = vperm.slane %v777_v55, %v1867_v39 }
 0x2aa   : > { %v765_v62 = vsel %vm446_vm1, %v764_v54, %v746_v42 }
 0x2ab   : > { %v793_v63 = vsel %vm446_vm1, %v792_v57, %v775_v56  ;;  %v771_v0 = vperm.slane %v765_v62, %v1867_v39  ;;  %v788_v1 = vrot.slane %v783_v59, 4  ;;  %v794_v2 = vrot.slane %v775_v56, 4 }
 0x2ac   : > { %1009 = vmatpush.msra.mxu0 %v793_v63 }
 0x2ad   : > { %v789_v3 = vsel %vm446_vm1, %v788_v1, %v771_v0  ;;  %v790_v4 = vrot.slane %v771_v0, 4  ;;  %v795_v5 = vsel %vm446_vm1, %v787_v52, %v794_v2 }
 0x2ae   : > { %963 = vmatpush.msrb.mxu2 %v789_v3  ;;  %1032 = vmatpush.msra.mxu1 %v795_v5 }
 0x2af   : > { %v791_v6 = vsel %vm446_vm1, %v783_v59, %v790_v4 }
 0x2b0   : > { %986 = vmatpush.msra.mxu3 %v791_v6 }
 0x2ed   : > { %v933_v7 = vpop.xlane.xlu2 %932 }
 0x2ee   : > { %1429 = vrcp.f32 %v933_v7 }
 0x2f4   : > { %v1430_v8 = vpop.eup %1429 }
 0x2f5   : > { %v943_v9 = vmul.f32 %v1430_v8, %v1962_v50  ;;  %v927_v10 = vpop.xlane.xlu0 %926 }
 0x2f6   : > { %1431 = vrcp.f32 %v927_v10 }
 0x2f7   : > { %1335 = vmatmul.msk.f32.vlgmr.msra.gmra.mxu0 %vm796_vm2, %v943_v9 }
 0x2fc   : > { %v1432_v11 = vpop.eup %1431 }
 0x2fd   : > { %v930_v12 = vpop.xlane.xlu1 %929  ;;  %v936_v13 = vpop.xlane.xlu0 %935  ;;  %v941_v14 = vmul.f32 %v1432_v11, %v1966_v58 }
 0x2fe   : > { %1433 = vrcp.f32 %v930_v12 }
 0x2ff   : > { %1435 = vrcp.f32 %v936_v13  ;;  %1333 = vmatmul.msk.f32.vlgmr.msrb.gmra.mxu2 %vm796_vm2, %v941_v14 }
 0x304   : > { %v1434_v15 = vpop.eup %1433 }
 0x305   : > { %v1436_v16 = vpop.eup %1435  ;;  %v942_v17 = vmul.f32 %v1434_v15, %v1972_v61 }
 0x306   : > { %v944_v18 = vmul.f32 %v1436_v16, %v1970_v60 }
 0x307   : > { %1334 = vmatmul.msk.f32.vlgmr.msra.gmra.mxu3 %vm796_vm2, %v942_v17 }
 0x308   : > { %1336 = vmatmul.msk.f32.vlgmr.msra.gmra.mxu1 %vm796_vm2, %v944_v18 }
 0x374   : > { %v1011_v50 = vpop.f32.mrf.mxu0 }
 0x375   : > { %v1037_v19 = vrot.slane %v1011_v50, 4 }
 0x382   : > { %v965_v20 = vpop.f32.mrf.mxu2 }
 0x383   : > { %v1039_v21 = vrot.slane %v965_v20, 4  ;;  %v1038_v22 = vsel %vm446_vm1, %v1037_v19, %v965_v20 }
 0x384   : > { %v1044_v24 = vperm.slane %v1038_v22, %v1858_v26 }
 0x385   : > { %v1034_v58 = vpop.f32.mrf.mxu1  ;;  %v1040_v23 = vsel %vm446_vm1, %v1011_v50, %v1039_v21 }
 0x386   : > { %v1049_v25 = vrot.slane %v1034_v58, 4  ;;  %v1048_v61 = vperm.slane %v1040_v23, %v1858_v26  ;;  %v1063_v29 = vrot.slane %v1044_v24, 4 }
 0x388   : > { %v1075_v32 = vrot.slane %v1048_v61, 4 }
 0x38a   : > { %v988_v27 = vpop.f32.mrf.mxu3 }
 0x38b   : > { %v1050_v60 = vsel %vm446_vm1, %v1049_v25, %v988_v27  ;;  %v1051_v28 = vrot.slane %v988_v27, 4 }
 0x38c   : > { %v1056_v30 = vperm.slane %v1050_v60, %v1858_v26 }
 0x38d   : > { %v1052_v31 = vsel %vm446_vm1, %v1034_v58, %v1051_v28 }
 0x38e   : > { %v1060_v33 = vperm.slane %v1052_v31, %v1858_v26  ;;  %v1061_v34 = vrot.slane %v1056_v30, 4  ;;  %v1064_v35 = vsel %vm446_vm1, %v1056_v30, %v1063_v29 }
 0x38f   : > { %v1072_v36 = vperm.slane %v1064_v35, %v1867_v39 }
 0x390   : > { %v1062_v37 = vsel %vm446_vm1, %v1061_v34, %v1044_v24  ;;  %v1073_v38 = vrot.slane %v1060_v33, 4  ;;  %v1076_v40 = vsel %vm446_vm1, %v1060_v33, %v1075_v32 }
 0x391   : > { %v1068_v41 = vperm.slane %v1062_v37, %v1867_v39  ;;  %v1084_v42 = vperm.slane %v1076_v40, %v1867_v39  ;;  %v1087_v43 = vrot.slane %v1072_v36, 4 }
 0x392   : > { %v1074_v44 = vsel %vm446_vm1, %v1073_v38, %v1048_v61 }
 0x393   : > { %v1080_v45 = vperm.slane %v1074_v44, %v1867_v39  ;;  %v1085_v46 = vrot.slane %v1068_v41, 4  ;;  %v1088_v47 = vsel %vm446_vm1, 0.0, %v1087_v43  ;;  %v1091_v48 = vrot.slane %v1084_v42, 4 }
 0x394   : > { %v1093_v49 = vsel %vm446_vm1, %v1087_v43, %v1068_v41  ;;  %v1098_v51 = vrot.slane %v1088_v47, 4 }
 0x395   : > { %v1086_v52 = vsel %vm446_vm1, 0.0, %v1085_v46  ;;  %v1089_v53 = vrot.slane %v1080_v45, 4  ;;  %v1092_v54 = vsel %vm446_vm1, 0.0, %v1091_v48  ;;  %v1097_v55 = vperm.slane %v1093_v49, %v1858_v26 }
 0x396   : > { %v1109_v56 = vrot.slane %v1092_v54, 4  ;;  %v1099_v57 = vsel %vm446_vm1, %v1098_v51, %v1086_v52  ;;  %v1104_v59 = vsel %vm446_vm1, %v1091_v48, %v1080_v45 }
 0x397   : > { %v1090_v62 = vsel %vm446_vm1, 0.0, %v1089_v53  ;;  %v1103_v63 = vperm.slane %v1099_v57, %v1858_v26  ;;  %v1108_v0 = vperm.slane %v1104_v59, %v1858_v26  ;;  %v1117_v1 = vrot.slane %v1097_v55, 4 }
 0x398   : > { %v1110_v2 = vsel %vm446_vm1, %v1109_v56, %v1090_v62 }
 0x399   : > { %v1114_v3 = vperm.slane %v1110_v2, %v1858_v26  ;;  %v1118_v4 = vsel %vm446_vm1, %v1103_v63, %v1117_v1  ;;  %v1129_v5 = vrot.slane %v1108_v0, 4  ;;  %v1115_v6 = vrot.slane %v1103_v63, 4 }
 0x39a   : > { %v1126_v7 = vperm.slane %v1118_v4, %v1867_v39 }
 0x39b   : > { %v1130_v8 = vsel %vm446_vm1, %v1114_v3, %v1129_v5  ;;  %v1116_v9 = vsel %vm446_vm1, %v1115_v6, %v1097_v55  ;;  %v1127_v10 = vrot.slane %v1114_v3, 4 }
 0x39c   : > { %v1138_v11 = vperm.slane %v1130_v8, %v1867_v39  ;;  %v1145_v12 = vrot.slane %v1126_v7, 4  ;;  %v1122_v13 = vperm.slane %v1116_v9, %v1867_v39 }
 0x39d   : > { %v1128_v14 = vsel %vm446_vm1, %v1127_v10, %v1108_v0 }
 0x39e   : > { %v1146_v26 = vsel %vm446_vm1, %v1138_v11, %v1145_v12  ;;  %v1143_v15 = vrot.slane %v1138_v11, 4  ;;  %v1134_v16 = vperm.slane %v1128_v14, %v1867_v39  ;;  %v1141_v17 = vrot.slane %v1122_v13, 4 }
 0x39f   : > { %1156 = vrot.lane.b32.xlu2 %v1146_v26, %s1641_s10 }
 0x3a0   : > { %v1144_v18 = vsel %vm446_vm1, %v1143_v15, %v1126_v7  ;;  %v1139_v50 = vrot.slane %v1134_v16, 4  ;;  %v1142_v19 = vsel %vm446_vm1, %v1134_v16, %v1141_v17 }
 0x3a1   : > { %1152 = vrot.lane.b32.xlu0 %v1144_v18, %s1642_s9  ;;  %1148 = vrot.lane.b32.xlu1 %v1142_v19, %s1643_s14 }
 0x3a2   : > { %v1140_v20 = vsel %vm446_vm1, %v1139_v50, %v1122_v13 }
 0x3f9   : > { %v1157_v58 = vpop.permute.xlu2 %1156 }
 0x413   : > { %v1153_v39 = vpop.permute.xlu0 %1152  ;;  %v1149_v21 = vpop.permute.xlu1 %1148 }
 0x414   : > { %v1159_v22 = vsel %vm796_vm2, %v1140_v20, %v1149_v21 }
 0x415   : > { %v1161_v23 = vsel %vm1160_vm3, %v1159_v22, %v1153_v39 }
 0x416   : > { %v1163_v24 = vsel %vm1162_vm4, %v1161_v23, %v1157_v58 }
 0x417   : > { %1164 = vst.msk [vmem:[%s333_s16] sm:$0xff] %vm345_vm0, %v1163_v24 }
 0x418   : > { %1584 = shalt.err (!%p1581_p8)
}
 0x419   : > { %1351 = dma.vmem_to_hbm [thread:$0]  (%p1713_p6), %s1179_s25, 128, %s1181_s1, %s1166_s22  }
 0x41a PF: > { %s2125_s6 = sld [smem:[#allocation15_spill]]  ;;  %s1192_s21 = sand.u32 1, %s1619_s18  }
 0x41b   : > { %s1193_s24 = scalar_lea.sflag [#allocation4], %s1192_s21 }
 0x420   : > { %p2126_p7 = scmp.ge.s32.totalorder %s2125_s6, 2 }
 0x422   : > { %p1368_p12 = pnand %p2126_p7, %p1722_p10 }
 0x424   : > { %p1369_p0 = pneg %p1368_p12 }
 0x426   : > { %1614 = dma.done.wait (%p1369_p0), %s1193_s24, 128  }
 0x427   : > { %1616 = vsyncadd (%p1369_p0), %s1193_s24, 4294967168  ;;  %s2127_s21 = sld [smem:[#allocation16_spill]]  ;;  %s2129_s18 = smov %s1623_s19 }
 0x428   : > { %s2128_s27 = sld [smem:[#allocation17_spill]]  ;;  %s2130_s19 = smov %s1627_s20 }
 0x42d   : > { %p22_p4 = scmp.ge.s32.totalorder %s2127_s21, 4  }
 0x42e   : > { %s2131_s20 = smov %s2128_s27 }
 0x42f   :  { %24 = sbr.rel (!%p22_p4) target bundleno = 11 (0xb), region = 117 }
 0x434   :  { %1199 = vsyncpa [#allocation3], 1 }
 0x435   :  { %1201 = vsyncpa [#allocation3 + $0x1], 1 }
 0x436   :  { %1202 = vsyncpa [#allocation6], 1 }
 0x437   :  { %1204 = vsyncpa [#allocation6 + $0x1], 1 }
 0x438   :  { %1205 = vsyncpa [#allocation9], 1 }
 0x439   :  { %1206 = vsyncpa [#allocation4], 1 }
 0x43a   :  { %1208 = vsyncpa [#allocation4 + $0x1], 1 }

</bundles_post_ra>
